<compile_context>
chip_gen: v7x
topology: tpu7x:2x2x1
jax: 0.10.0
libtpu: 0.0.40
codegen_flags: <defaults>
</compile_context>

<pallas_src>
import jax
import jax.numpy as jnp
from jax import lax
from jax.experimental import pallas as pl
from jax.experimental.pallas import tpu as pltpu

LN_EPS = 1e-5
_MIB = 1024 * 1024


def _vmem_capacity_bytes():
    # v5e/v6e: 128 MiB physical, v7x: 64 MiB per TensorCore.  Fall back to the
    # smallest (v7x) figure if the query is unavailable so the limit is always
    # legal on every generation.
    try:
        return int(pltpu.get_tpu_info().vmem_capacity_bytes)
    except Exception:
        return 64 * _MIB


def sac_fc1_kernel(x_ref, w_ref, b_ref, g_ref, beta_ref, o_ref):
    mat_dtype = w_ref.dtype
    x = x_ref[...]
    if x.dtype == jnp.uint8:
        # uint8 is already non-negative: skip ReLU, cast straight to the matmul
        # dtype (u8 -> bf16/f32 is exact for 0..255).  The 1/255 scale is
        # pre-folded into w_ref by the wrapper.
        h = x.astype(mat_dtype)
    else:
        # Cast first (bf16 halves VALU / load-store pressure on the big tile),
        # then ReLU; ReLU commutes with the monotone downcast so it's exact.
        h = jnp.maximum(x.astype(mat_dtype), jnp.zeros((), mat_dtype))
    # Linear: y = h @ W^T + b (W passed pre-transposed as (in, out)), f32 acc.
    y = jnp.dot(h, w_ref[...], preferred_element_type=jnp.float32) + b_ref[...]
    # LayerNorm over the latent dim: single fused stats pass, biased variance,
    # eps inside rsqrt (matches PyTorch).  Clamp var >= 0 against cancellation.
    n = y.shape[-1]
    s1 = jnp.sum(y, axis=-1, keepdims=True)
    s2 = jnp.sum(y * y, axis=-1, keepdims=True)
    mean = s1 * (1.0 / n)
    var = jnp.maximum(s2 * (1.0 / n) - mean * mean, 0.0)
    inv = lax.rsqrt(var + LN_EPS)
    o_ref[...] = ((y - mean) * inv * g_ref[...] + beta_ref[...]).astype(o_ref.dtype)


def _plan_tiles(M, input_size, latent_size, x_itemsize, mat_itemsize,
                out_itemsize, tile_m=None):
    # Sublane/packing alignment: 32 rows for 1-byte dtypes, 8 for f32.
    align = 32 if x_itemsize == 1 else 8
    capacity = _vmem_capacity_bytes()
    w_bytes = input_size * latent_size * mat_itemsize
    params_bytes = 2 * 3 * latent_size * 4          # bias/gamma/beta, 2-buffered
    per_row = (2 * input_size * x_itemsize          # x tile, double-buffered
               + 2 * latent_size * out_itemsize     # out tile, double-buffered
               + input_size * mat_itemsize          # h temporary
               + 3 * latent_size * 4)               # y / LN temporaries (f32)
    if tile_m is None:
        # Keep the streamed tiles within ~3/8 of VMEM after subtracting the
        # resident (double-buffered) weight and params; cap at 4096 rows.
        budget = (capacity * 3) // 8 - 2 * w_bytes - params_bytes
        budget = max(budget, per_row * align)
        tile_m = min(4096, budget // per_row)
    tm = max(align, (tile_m // align) * align)
    if M <= tm:
        tm = M                     # single full-extent block: no (8,128) gate
    grid = (pl.cdiv(M, tm),)       # ragged final block handled by Pallas
    est = (2 * tm * input_size * x_itemsize
           + 2 * tm * latent_size * out_itemsize
           + 2 * w_bytes + params_bytes
           + tm * input_size * mat_itemsize
           + 3 * tm * latent_size * 4)
    vmem_limit = int(min(capacity - 2 * _MIB, max(8 * _MIB, est + 4 * _MIB)))
    return tm, grid, vmem_limit


def prepare_weights(w_t, *, input_is_uint8, matmul_dtype=jnp.bfloat16):
    """Fold the 1/255 uint8 scale into W and cast to the MXU dtype.

    Call once and reuse across steps (pass as `w_prepared=`) to avoid an extra
    per-call HBM pass over W.  Valid because relu(x/255) @ W == relu(x) @ (W/255)
    (ReLU commutes with a positive scale); the bias is left unscaled.
    """
    w = w_t.astype(jnp.float32)
    if input_is_uint8:
        w = w * (1.0 / 255.0)
    return w.astype(matmul_dtype)


def sac_fc1_forward(x, w_t, b, gamma, beta, *, matmul_dtype=jnp.bfloat16,
                    out_dtype=jnp.float32, tile_m=None, w_prepared=None):
    """SacFc1Model.forward.

    x: (..., C, H, W) with up to 2 leading dims (T, B); uint8 inputs stream
    directly into the kernel (the 1/255 scale lives in the weights).
    Returns (..., latent_size) in `out_dtype` (float32 by default, bf16 halves
    output HBM traffic if downstream tolerates it).
    """
    lead_dim = x.ndim - 3
    assert lead_dim in (0, 1, 2), "expected 3 data dims with <=2 leading dims"
    lead_shape = x.shape[:lead_dim]
    C, H, W = x.shape[lead_dim:]
    input_size = C * H * W
    assert w_t.shape[0] == input_size
    latent_size = w_t.shape[1]
    M = 1
    for d in lead_shape:
        M *= d
    M = max(M, 1)

    is_u8 = x.dtype == jnp.uint8
    if w_prepared is None:
        w_prepared = prepare_weights(w_t, input_is_uint8=is_u8,
                                     matmul_dtype=matmul_dtype)
    x2d = x.reshape(M, input_size)
    if not is_u8:
        x2d = x2d.astype(jnp.float32)

    b2d = b.astype(jnp.float32).reshape(1, latent_size)
    g2d = gamma.astype(jnp.float32).reshape(1, latent_size)
    beta2d = beta.astype(jnp.float32).reshape(1, latent_size)

    tm, grid, vmem_limit = _plan_tiles(
        M, input_size, latent_size, x2d.dtype.itemsize,
        jnp.dtype(w_prepared.dtype).itemsize, jnp.dtype(out_dtype).itemsize,
        tile_m)

    out = pl.pallas_call(
        sac_fc1_kernel,
        out_shape=jax.ShapeDtypeStruct((M, latent_size), out_dtype),
        grid=grid,
        in_specs=[
            pl.BlockSpec((tm, input_size), lambda i: (i, 0)),           # x tile
            pl.BlockSpec((input_size, latent_size), lambda i: (0, 0)),  # W (resident)
            pl.BlockSpec((1, latent_size), lambda i: (0, 0)),           # bias
            pl.BlockSpec((1, latent_size), lambda i: (0, 0)),           # gamma
            pl.BlockSpec((1, latent_size), lambda i: (0, 0)),           # beta
        ],
        out_specs=pl.BlockSpec((tm, latent_size), lambda i: (i, 0)),
        compiler_params=pltpu.CompilerParams(
            dimension_semantics=("parallel",),   # shards rows across v7x's 2 TCs
            vmem_limit_bytes=vmem_limit),
    )(x2d, w_prepared, b2d, g2d, beta2d)

    return out.reshape(lead_shape + (latent_size,))


def reference_forward(x, w_t, b, gamma, beta):
    if x.dtype == jnp.uint8:
        x = x.astype(jnp.float32) * (1.0 / 255.0)
    x = x.astype(jnp.float32)
    lead_dim = x.ndim - 3
    lead_shape = x.shape[:lead_dim]
    input_size = x.shape[lead_dim] * x.shape[lead_dim + 1] * x.shape[lead_dim + 2]
    h = jnp.maximum(x.reshape(-1, input_size), 0.0)
    y = h @ w_t.astype(jnp.float32) + b[None, :]
    mean = y.mean(-1, keepdims=True)
    var = ((y - mean) ** 2).mean(-1, keepdims=True)
    o = (y - mean) / jnp.sqrt(var + LN_EPS) * gamma[None, :] + beta[None, :]
    return o.reshape(lead_shape + (w_t.shape[1],))


if __name__ == "__main__":
    C, H, W = 4, 8, 8
    input_size = C * H * W          # 256
    latent_size = 128

    key = jax.random.PRNGKey(0)
    kx, kw, kb, kg, kbt, ku, kt = jax.random.split(key, 7)

    # nn.Linear-style uniform init; non-trivial LayerNorm affine params.
    bound = 1.0 / float(input_size) ** 0.5
    w = jax.random.uniform(kw, (latent_size, input_size), jnp.float32, -bound, bound)
    b = jax.random.uniform(kb, (latent_size,), jnp.float32, -bound, bound)
    w_t = jnp.transpose(w)  # (input_size, latent_size) for h @ W^T
    gamma = 1.0 + 0.1 * jax.random.normal(kg, (latent_size,), jnp.float32)
    beta = 0.1 * jax.random.normal(kbt, (latent_size,), jnp.float32)

    T, B = 2, 2
    x = jax.random.normal(kx, (T, B, C, H, W), dtype=jnp.float32)
    ref = reference_forward(x, w_t, b, gamma, beta)

    # 1) (T, B) leading dims, f32 matmul path (tight tolerance).
    out_f32 = jax.block_until_ready(
        sac_fc1_forward(x, w_t, b, gamma, beta, matmul_dtype=jnp.float32))
    assert out_f32.shape == (T, B, latent_size)
    assert jnp.allclose(out_f32, ref, atol=1e-4, rtol=1e-4)

    # 2) Default bf16-MXU fast path (bf16 ReLU/cast, f32 accumulation).
    out_bf16 = jax.block_until_ready(sac_fc1_forward(x, w_t, b, gamma, beta))
    assert out_bf16.shape == (T, B, latent_size)
    assert jnp.allclose(out_bf16, ref, atol=5e-2, rtol=5e-2)

    # 3) uint8 input streamed into the kernel, f32 matmul (1/255 folded into W,
    #    no in-kernel ReLU).
    xu8 = jax.random.randint(ku, (T, B, C, H, W), 0, 256, dtype=jnp.int32
                             ).astype(jnp.uint8)
    ref_u8 = reference_forward(xu8, w_t, b, gamma, beta)
    out_u8 = jax.block_until_ready(
        sac_fc1_forward(xu8, w_t, b, gamma, beta, matmul_dtype=jnp.float32))
    assert jnp.allclose(out_u8, ref_u8, atol=1e-4, rtol=1e-4)

    # 4) uint8 input on the default bf16 path (W and 1/255 quantized to bf16),
    #    with the weight preprocessing hoisted out of the call.
    w_prep = prepare_weights(w_t, input_is_uint8=True, matmul_dtype=jnp.bfloat16)
    out_u8_bf16 = jax.block_until_ready(
        sac_fc1_forward(xu8, w_t, b, gamma, beta, w_prepared=w_prep))
    assert jnp.allclose(out_u8_bf16, ref_u8, atol=5e-2, rtol=5e-2)

    # 5) Ragged-M regression: M=20, forced TILE_M=8 -> grid of 3 with a masked
    #    final block; no wrapper-side pad/slice copies.
    xb = jax.random.normal(kt, (20, C, H, W), dtype=jnp.float32)
    ref_b = reference_forward(xb, w_t, b, gamma, beta)
    out_b = jax.block_until_ready(
        sac_fc1_forward(xb, w_t, b, gamma, beta,
                        matmul_dtype=jnp.float32, tile_m=8))
    assert out_b.shape == (20, latent_size)
    assert jnp.allclose(out_b, ref_b, atol=1e-4, rtol=1e-4)

    # 6) bf16 output option (halves output HBM bytes) on the ragged case.
    out_b_bf16 = jax.block_until_ready(
        sac_fc1_forward(xb, w_t, b, gamma, beta,
                        out_dtype=jnp.bfloat16, tile_m=8))
    assert out_b_bf16.dtype == jnp.bfloat16
    assert jnp.allclose(out_b_bf16.astype(jnp.float32), ref_b,
                        atol=5e-2, rtol=5e-2)

    print("KERNEL_OK")
</pallas_src>

<mosaic_0001>
module attributes {stable_mosaic.version = 11 : i64} {
  func.func @sac_fc1_kernel(%arg0: i32, %arg1: memref<4x256xf32, #tpu.memory_space<vmem>>, %arg2: memref<256x128xf32, #tpu.memory_space<vmem>>, %arg3: memref<1x128xf32, #tpu.memory_space<vmem>>, %arg4: memref<1x128xf32, #tpu.memory_space<vmem>>, %arg5: memref<1x128xf32, #tpu.memory_space<vmem>>, %arg6: memref<4x128xf32, #tpu.memory_space<vmem>>) attributes {dimension_semantics = [#tpu.dimension_semantics<parallel>], iteration_bounds = array<i64: 1>, scalar_prefetch = 0 : i64, scratch_operands = 0 : i64, tpu.core_type = #tpu.core_type<tc>, window_params = [{transform_indices = @transform_0, window_bounds = array<i64: 4, 256>}, {pipeline_mode = #tpu.pipeline_mode<synchronous>, transform_indices = @transform_1, window_bounds = array<i64: 256, 128>}, {pipeline_mode = #tpu.pipeline_mode<synchronous>, transform_indices = @transform_2, window_bounds = array<i64: 1, 128>}, {pipeline_mode = #tpu.pipeline_mode<synchronous>, transform_indices = @transform_3, window_bounds = array<i64: 1, 128>}, {pipeline_mode = #tpu.pipeline_mode<synchronous>, transform_indices = @transform_4, window_bounds = array<i64: 1, 128>}, {transform_indices = @transform_5, window_bounds = array<i64: 4, 128>}]} {
    %c0 = arith.constant 0 : index
    %c0_0 = arith.constant 0 : index
    %0 = vector.load %arg1[%c0, %c0_0] : memref<4x256xf32, #tpu.memory_space<vmem>>, vector<4x256xf32>
    %cst = arith.constant 0.000000e+00 : f32
    %1 = vector.broadcast %cst : f32 to vector<4x256xf32>
    %2 = arith.maximumf %0, %1 : vector<4x256xf32>
    %c0_1 = arith.constant 0 : index
    %c0_2 = arith.constant 0 : index
    %3 = vector.load %arg2[%c0_1, %c0_2] : memref<256x128xf32, #tpu.memory_space<vmem>>, vector<256x128xf32>
    %cst_3 = arith.constant dense<0.000000e+00> : vector<4x128xf32>
    %4 = tpu.matmul %2, %3, %cst_3 {dimension_numbers = #tpu.dot_dimension_numbers<[1], [0], [0], [1], [0, 0, 1, 1], [], []>} : vector<4x256xf32>, vector<256x128xf32>, vector<4x128xf32> -> vector<4x128xf32>
    %c0_4 = arith.constant 0 : index
    %c0_5 = arith.constant 0 : index
    %5 = vector.load %arg3[%c0_4, %c0_5] : memref<1x128xf32, #tpu.memory_space<vmem>>, vector<1x128xf32>
    %6 = vector.broadcast %5 : vector<1x128xf32> to vector<4x128xf32>
    %7 = arith.addf %4, %6 : vector<4x128xf32>
    %cst_6 = arith.constant dense<0.000000e+00> : vector<4xf32>
    %8 = vector.multi_reduction <add>, %7, %cst_6 [1] : vector<4x128xf32> to vector<4xf32>
    %9 = vector.shape_cast %8 : vector<4xf32> to vector<4x1xf32>
    %10 = arith.mulf %7, %7 : vector<4x128xf32>
    %cst_7 = arith.constant dense<0.000000e+00> : vector<4xf32>
    %11 = vector.multi_reduction <add>, %10, %cst_7 [1] : vector<4x128xf32> to vector<4xf32>
    %12 = vector.shape_cast %11 : vector<4xf32> to vector<4x1xf32>
    %cst_8 = arith.constant 7.812500e-03 : f32
    %13 = vector.broadcast %cst_8 : f32 to vector<4x1xf32>
    %14 = arith.mulf %9, %13 : vector<4x1xf32>
    %cst_9 = arith.constant 7.812500e-03 : f32
    %15 = vector.broadcast %cst_9 : f32 to vector<4x1xf32>
    %16 = arith.mulf %12, %15 : vector<4x1xf32>
    %17 = arith.mulf %14, %14 : vector<4x1xf32>
    %18 = arith.subf %16, %17 : vector<4x1xf32>
    %cst_10 = arith.constant 0.000000e+00 : f32
    %19 = vector.broadcast %cst_10 : f32 to vector<4x1xf32>
    %20 = arith.maximumf %18, %19 : vector<4x1xf32>
    %cst_11 = arith.constant 9.99999974E-6 : f32
    %21 = vector.broadcast %cst_11 : f32 to vector<4x1xf32>
    %22 = arith.addf %20, %21 : vector<4x1xf32>
    %23 = math.rsqrt %22 : vector<4x1xf32>
    %24 = vector.broadcast %14 : vector<4x1xf32> to vector<4x128xf32>
    %25 = arith.subf %7, %24 : vector<4x128xf32>
    %26 = vector.broadcast %23 : vector<4x1xf32> to vector<4x128xf32>
    %27 = arith.mulf %25, %26 : vector<4x128xf32>
    %c0_12 = arith.constant 0 : index
    %c0_13 = arith.constant 0 : index
    %28 = vector.load %arg4[%c0_12, %c0_13] : memref<1x128xf32, #tpu.memory_space<vmem>>, vector<1x128xf32>
    %29 = vector.broadcast %28 : vector<1x128xf32> to vector<4x128xf32>
    %30 = arith.mulf %27, %29 : vector<4x128xf32>
    %c0_14 = arith.constant 0 : index
    %c0_15 = arith.constant 0 : index
    %31 = vector.load %arg5[%c0_14, %c0_15] : memref<1x128xf32, #tpu.memory_space<vmem>>, vector<1x128xf32>
    %32 = vector.broadcast %31 : vector<1x128xf32> to vector<4x128xf32>
    %33 = arith.addf %30, %32 : vector<4x128xf32>
    %c0_16 = arith.constant 0 : index
    %c0_17 = arith.constant 0 : index
    %34 = vector.load %arg6[%c0_16, %c0_17] : memref<4x128xf32, #tpu.memory_space<vmem>>, vector<4x128xf32>
    tpu.vector_store %arg6[%c0_16, %c0_17], %33 {strides = array<i32>} : memref<4x128xf32, #tpu.memory_space<vmem>>, vector<4x128xf32>,
    return
  }
  func.func @transform_0(%arg0: i32) -> (i32, i32) {
    %c0_i32 = arith.constant 0 : i32
    %c0_i32_0 = arith.constant 0 : i32
    return %arg0, %c0_i32 : i32, i32
  }
  func.func @transform_1(%arg0: i32) -> (i32, i32) {
    %c0_i32 = arith.constant 0 : i32
    %c0_i32_0 = arith.constant 0 : i32
    %c0_i32_1 = arith.constant 0 : i32
    return %c0_i32, %c0_i32_0 : i32, i32
  }
  func.func @transform_2(%arg0: i32) -> (i32, i32) {
    %c0_i32 = arith.constant 0 : i32
    %c0_i32_0 = arith.constant 0 : i32
    %c0_i32_1 = arith.constant 0 : i32
    return %c0_i32, %c0_i32_0 : i32, i32
  }
  func.func @transform_3(%arg0: i32) -> (i32, i32) {
    %c0_i32 = arith.constant 0 : i32
    %c0_i32_0 = arith.constant 0 : i32
    %c0_i32_1 = arith.constant 0 : i32
    return %c0_i32, %c0_i32_0 : i32, i32
  }
  func.func @transform_4(%arg0: i32) -> (i32, i32) {
    %c0_i32 = arith.constant 0 : i32
    %c0_i32_0 = arith.constant 0 : i32
    %c0_i32_1 = arith.constant 0 : i32
    return %c0_i32, %c0_i32_0 : i32, i32
  }
  func.func @transform_5(%arg0: i32) -> (i32, i32) {
    %c0_i32 = arith.constant 0 : i32
    %c0_i32_0 = arith.constant 0 : i32
    return %arg0, %c0_i32 : i32, i32
  }
}

</mosaic_0001>

<bundles_post_ra>
// kernel: tpu_custom_call.1
= control target key start
LH: loop header
LB: loop body
LE: loop exit
PB: predicated region body
PF: predicated region fallthrough
CT: control target
= control target key end

     0   :  { %10 = vsyncpa [#allocation3], 0  ;;  %s447_s0 = inlined_call_operand.hbm [shape: f32[4,256], index: 0, kind: input, shape index: {}]   ;;  %s448_s1 = inlined_call_operand.hbm [shape: f32[256,128], index: 1, kind: input, shape index: {}]   ;;  %s449_s2 = inlined_call_operand.vmem [shape: f32[1,128], index: 2, kind: input, shape index: {}]   ;;  %s450_s3 = inlined_call_operand.vmem [shape: f32[1,128], index: 3, kind: input, shape index: {}]   ;;  %s451_s4 = inlined_call_operand.vmem [shape: f32[1,128], index: 4, kind: input, shape index: {}]   ;;  %s452_s5 = inlined_call_operand.hbm [shape: f32[4,128], index: 5, kind: output, shape index: {}]  }
   0x1   :  { %11 = vsyncpa [#allocation6], 0 }
   0x2   :  { %12 = vsyncpa [#allocation4], 0  ;;  %s360_s18 = smov [#allocation2]   ;;  %s361_s20 = smov [#allocation5]  }
   0x3   :  { %s19_s19 = sshll.u32 %s360_s18, 4  ;;  %s28_s21 = sshll.u32 %s361_s20, 4  ;;  %s20_s19 = int_to_ptr.vmem [resolvable:$true] %s19_s19  ;;  %s395_s21 = int_to_ptr.vmem [resolvable:$true] %s28_s21 }
   0x4   :  { %s288_s24 = scalar_lea.hbm %s447_s0, 128 }
   0x5   :  { %p289_p0 = scmp.ne.s32.totalorder %s447_s0, %s288_s24  ;;  %p292_p1 = scmp.lt.u32.totalorder %s288_s24, %s447_s0 }
   0x7   :  { %p294_p2 = pnand %p292_p1, %p289_p0 }
   0x9   :  { %297 = shalt.err (!%p294_p2)
}
   0xa   :  { %s298_s29 = scalar_lea.vmem %s20_s19, 128  ;;  %p303_p4 = scmp.lt.s32.totalorder %s20_s19, %s20_s19 }
   0xb   :  { %p299_p3 = scmp.ne.s32.totalorder %s20_s19, %s298_s29  ;;  %p304_p5 = scmp.lt.s32.totalorder %s298_s29, %s298_s29 }
   0xd   :  { %p305_p6 = por %p304_p5, %p303_p4 }
   0xf   :  { %p306_p7 = pnand %p305_p6, %p299_p3 }
  0x11   :  { %309 = shalt.err (!%p306_p7)
}
  0x12   :  { %22 = dma.hbm_to_vmem [thread:$0]  %s447_s0, 128, %s20_s19, [#allocation3]  }
  0x13   :  { %s310_s9 = scalar_lea.hbm %s448_s1, 4096 }
  0x14   :  { %p311_p8 = scmp.ne.s32.totalorder %s448_s1, %s310_s9  ;;  %p314_p9 = scmp.lt.u32.totalorder %s310_s9, %s448_s1 }
  0x16   :  { %p316_p10 = pnand %p314_p9, %p311_p8 }
  0x18   :  { %319 = shalt.err (!%p316_p10)
}
  0x19   :  { %s320_s14 = scalar_lea.vmem %s395_s21, 4096  ;;  %p325_p12 = scmp.lt.s32.totalorder %s395_s21, %s395_s21 }
  0x1a   :  { %p321_p11 = scmp.ne.s32.totalorder %s395_s21, %s320_s14  ;;  %p326_p13 = scmp.lt.s32.totalorder %s320_s14, %s320_s14 }
  0x1c   :  { %p327_p0 = por %p326_p13, %p325_p12 }
  0x1e   :  { %p328_p1 = pnand %p327_p0, %p321_p11 }
  0x20   :  { %331 = shalt.err (!%p328_p1)
}
  0x21   :  { %s362_s0 = smov 128   ;;  %s363_s15 = smov 8  }
  0x22   :  { %34 = dma.hbm_to_vmem [thread:$0]  %s448_s1, 4096, %s395_s21, [#allocation6], %s362_s0, %s362_s0, %s363_s15  }
  0x23   :  { %354 = dma.done.wait [#allocation3], 128  }
  0x24   :  { %355 = vsyncadd [#allocation3], 4294967168 }
  0x25   :  { %356 = dma.done.wait [#allocation6], 4096  }
  0x26   :  { %357 = vsyncadd [#allocation6], 4294963200  ;;  %v65_v0 = vld [vmem:[#allocation5 + $0x80] sm:$0xff]  ;;  %v66_v1 = vld [vmem:[#allocation5 + $0x88] sm:$0xff]  ;;  %vm161_vm0 = vcmask 1043456   ;;  %s364_s22 = smov [#allocation7]  }
  0x27   :  { %v49_v2 = vld [vmem:[#allocation5] sm:$0xff]  ;;  %v249_v3 = vpack.c.bf16 %v66_v1, %v65_v0  ;;  %v50_v4 = vld [vmem:[#allocation5 + $0x8] sm:$0xff]  ;;  %v67_v5 = vld [vmem:[#allocation5 + $0x90] sm:$0xff]  ;;  %s201_s23 = sshll.u32 %s364_s22, 4  ;;  %s202_s23 = int_to_ptr.vmem [resolvable:$true] %s201_s23 }
  0x28   :  { %v68_v6 = vld [vmem:[#allocation5 + $0x98] sm:$0xff]  ;;  %v251_v7 = vpack.c.bf16 %v50_v4, %v49_v2  ;;  %v51_v9 = vld [vmem:[#allocation5 + $0x10] sm:$0xff]  ;;  %v69_v11 = vld [vmem:[#allocation5 + $0xa0] sm:$0xff]  ;;  %s332_s24 = scalar_lea.vmem %s202_s23, 64  ;;  %p337_p3 = scmp.lt.s32.totalorder %s202_s23, %s202_s23 }
  0x29   :  { %v253_v8 = vpack.c.bf16 %v68_v6, %v67_v5  ;;  %v52_v10 = vld [vmem:[#allocation5 + $0x18] sm:$0xff]  ;;  %250 = vmatprep.subr.bf16.mxu0 %v249_v3  ;;  %v70_v12 = vld [vmem:[#allocation5 + $0xa8] sm:$0xff]  ;;  %v53_v15 = vld [vmem:[#allocation5 + $0x20] sm:$0xff]  ;;  %p333_p2 = scmp.ne.s32.totalorder %s202_s23, %s332_s24  ;;  %p338_p4 = scmp.lt.s32.totalorder %s332_s24, %s332_s24 }
  0x2a   :  { %252 = vmatpush3.bf16.msra.mxu0 %v251_v7  ;;  %v255_v13 = vpack.c.bf16 %v52_v10, %v51_v9  ;;  %v257_v14 = vpack.c.bf16 %v70_v12, %v69_v11  ;;  %v54_v16 = vld [vmem:[#allocation5 + $0x28] sm:$0xff]  ;;  %v71_v17 = vld [vmem:[#allocation5 + $0xb0] sm:$0xff]  ;;  %v72_v18 = vld [vmem:[#allocation5 + $0xb8] sm:$0xff] }
  0x2b   :  { %254 = vmatprep.subr.bf16.mxu0 %v253_v8  ;;  %v259_v19 = vpack.c.bf16 %v54_v16, %v53_v15  ;;  %v261_v20 = vpack.c.bf16 %v72_v18, %v71_v17  ;;  %v55_v21 = vld [vmem:[#allocation5 + $0x30] sm:$0xff]  ;;  %v56_v22 = vld [vmem:[#allocation5 + $0x38] sm:$0xff]  ;;  %v73_v23 = vld [vmem:[#allocation5 + $0xc0] sm:$0xff]  ;;  %p339_p5 = por %p338_p4, %p337_p3 }
  0x2c   :  { %v74_v24 = vld [vmem:[#allocation5 + $0xc8] sm:$0xff]  ;;  %v47_v25 = vld [vmem:[#allocation2] sm:$0xff]  ;;  %v263_v27 = vpack.c.bf16 %v56_v22, %v55_v21  ;;  %v57_v29 = vld [vmem:[#allocation5 + $0x40] sm:$0xff] }
  0x2d   :  { %v48_v26 = vmax.f32 %v47_v25, 0.0  ;;  %v265_v28 = vpack.c.bf16 %v74_v24, %v73_v23  ;;  %v58_v30 = vld [vmem:[#allocation5 + $0x48] sm:$0xff]  ;;  %v75_v32 = vld [vmem:[#allocation5 + $0xd0] sm:$0xff]  ;;  %v76_v33 = vld [vmem:[#allocation5 + $0xd8] sm:$0xff]  ;;  %p340_p6 = pnand %p339_p5, %p333_p2 }
  0x2e   :  { %256 = vmatpush3.bf16.msra.mxu0 %v255_v13  ;;  %v267_v34 = vpack.c.bf16 %v58_v30, %v57_v29  ;;  %v269_v35 = vpack.c.bf16 %v76_v33, %v75_v32  ;;  %v59_v36 = vld [vmem:[#allocation5 + $0x50] sm:$0xff]  ;;  %v60_v37 = vld [vmem:[#allocation5 + $0x58] sm:$0xff]  ;;  %v77_v38 = vld [vmem:[#allocation5 + $0xe0] sm:$0xff] }
  0x2f   :  { %258 = vmatprep.subr.bf16.mxu0 %v257_v14  ;;  %v89_v31 = vcombine.high %v48_v26, %v48_v26  ;;  %v78_v39 = vld [vmem:[#allocation5 + $0xe8] sm:$0xff]  ;;  %v271_v40 = vpack.c.bf16 %v60_v37, %v59_v36  ;;  %v61_v42 = vld [vmem:[#allocation5 + $0x60] sm:$0xff]  ;;  %v79_v44 = vld [vmem:[#allocation5 + $0xf0] sm:$0xff] }
  0x30   :  { %v273_v41 = vpack.c.bf16 %v78_v39, %v77_v38  ;;  %v62_v43 = vld [vmem:[#allocation5 + $0x68] sm:$0xff]  ;;  %v80_v45 = vld [vmem:[#allocation5 + $0xf8] sm:$0xff]  ;;  %v63_v48 = vld [vmem:[#allocation5 + $0x70] sm:$0xff] }
  0x31   :  { %155 = vmatprep.mubr.f32.mxu0 %v89_v31  ;;  %v275_v46 = vpack.c.bf16 %v62_v43, %v61_v42  ;;  %v277_v47 = vpack.c.bf16 %v80_v45, %v79_v44  ;;  %v64_v49 = vld [vmem:[#allocation5 + $0x78] sm:$0xff] }
  0x32   :  { %260 = vmatpush3.bf16.msra.mxu0 %v259_v19  ;;  %v279_v50 = vpack.c.bf16 %v64_v49, %v63_v48  ;;  %v211_v52 = vld [vmem:[%s449_s2] ss:$0 sm:$0xff] }
  0x33   :  { %262 = vmatprep.subr.bf16.mxu0 %v261_v20  ;;  %v212_v5 = vld [vmem:[%s450_s3] ss:$0 sm:$0xff] }
  0x34   :  { %v213_v7 = vld [vmem:[%s451_s4] ss:$0 sm:$0xff] }
  0x36   :  { %264 = vmatpush3.bf16.msra.mxu0 %v263_v27 }
  0x37   :  { %266 = vmatprep.subr.bf16.mxu0 %v265_v28 }
  0x3a   :  { %268 = vmatpush3.bf16.msra.mxu0 %v267_v34 }
  0x3b   :  { %270 = vmatprep.subr.bf16.mxu0 %v269_v35 }
  0x3e   :  { %272 = vmatpush3.bf16.msra.mxu0 %v271_v40 }
  0x3f   :  { %274 = vmatprep.subr.bf16.mxu0 %v273_v41 }
  0x42   :  { %276 = vmatpush3.bf16.msra.mxu0 %v275_v46 }
  0x43   :  { %278 = vmatprep.subr.bf16.mxu0 %v277_v47 }
  0x46   :  { %280 = vmatpush3.bf16.msra.mxu0 %v279_v50 }
  0x49   :  { %156 = vmatmul.mubr.f32.vlgmr.msra.gmra.mrb[0].mxu0 %v48_v26 }
 0x11c   :  { %v246_v51 = vpop.f32.mrb[0].mxu0 }
 0x11d   :  { %v247_v53 = vpop.f32.mrb[1].mxu0 }
 0x11e   :  { %v248_v54 = vadd.f32 %v247_v53, %v246_v51 }
 0x120   :  { %v158_v55 = vadd.f32 %v248_v54, %v211_v52 }
 0x122   :  { %v162_v56 = vsel %vm161_vm0, %v158_v55, 0.0  ;;  %v165_v57 = vmul.f32 %v158_v55, %v158_v55 }
 0x123   :  { %163 = vadd.xlane.f32.xlu0 %v162_v56 }
 0x124   :  { %v166_v58 = vsel %vm161_vm0, %v165_v57, 0.0 }
 0x127   :  { %167 = vadd.xlane.f32.xlu0 %v166_v58 }
 0x1b0   :  { %v164_v59 = vpop.xlane.xlu0 %163 }
 0x1b1   :  { %v169_v60 = vmul.f32 0.0078125, %v164_v59 }
 0x1b3   :  { %v171_v62 = vmul.f32 %v169_v60, %v169_v60  ;;  %v176_v3 = vsub.f32 %v158_v55, %v169_v60 }
 0x1b4   :  { %v168_v61 = vpop.xlane.xlu0 %167 }
 0x1b5   :  { %v170_v63 = vmul.f32 0.0078125, %v168_v61 }
 0x1b7   :  { %v172_v0 = vsub.f32 %v170_v63, %v171_v62 }
 0x1b9   :  { %v173_v1 = vmax.f32 %v172_v0, 0.0 }
 0x1bb   :  { %v174_v2 = vadd.f32 1e-05, %v173_v1 }
 0x1bd   :  { %286 = vrsqrt.f32 %v174_v2 }
 0x1c7   :  { %v287_v4 = vpop.eup %286 }
 0x1c8   :  { %v177_v6 = vmul.f32 %v287_v4, %v176_v3 }
 0x1ca   :  { %v185_v8 = vmul.f32 %v212_v5, %v177_v6 }
 0x1cc   :  { %v193_v9 = vadd.f32 %v213_v7, %v185_v8 }
 0x1ce   :  { %194 = vst [vmem:[#allocation7] sm:$0xf] %v193_v9 }
 0x1cf   :  { %343 = shalt.err (!%p340_p6)
}
 0x1d0   :  { %s344_s26 = scalar_lea.hbm %s452_s5, 64 }
 0x1d1   :  { %p345_p7 = scmp.ne.s32.totalorder %s452_s5, %s344_s26  ;;  %p348_p8 = scmp.lt.u32.totalorder %s344_s26, %s452_s5 }
 0x1d3   :  { %p350_p9 = pnand %p348_p8, %p345_p7 }
 0x1d5   :  { %353 = shalt.err (!%p350_p9)
}
 0x1d6   :  { %204 = dma.vmem_to_hbm [thread:$0]  %s202_s23, 64, %s452_s5, [#allocation4]  }
 0x1d7   :  { %358 = dma.done.wait [#allocation4], 64  }
 0x1d8   :  { %359 = vsyncadd [#allocation4], 4294967232 }
 0x1d9   :  { %208 = vsyncpa [#allocation3], 1 }
 0x1da   :  { %209 = vsyncpa [#allocation6], 1 }
 0x1db   :  { %210 = vsyncpa [#allocation4], 1 }

</bundles_post_ra>
